<compile_context>
chip_gen: v5e
topology: v5e:2x2
jax: 0.10.0
libtpu: 0.0.40
codegen_flags: <defaults>
</compile_context>

<pallas_src>
import jax
import jax.numpy as jnp
from jax.experimental import pallas as pl
from jax.experimental.pallas import tpu as pltpu

IN_DIM = 32
H1 = 64
H2 = 64
OUT_DIM = 16
BN_EPS = 1e-5


def mlp_kernel(x_ref, w1_ref, w2_ref, w3_ref, bias_ref, o_ref):
    """Whole MLP for one batch tile. BN is pre-folded into w2/b2 (eval mode)."""
    x = x_ref[...]

    # Packed biases (f32): row 0 = b1 (64), row 1 = folded b2 (64),
    # row 2 = b3 (16, zero-padded to 64).
    b1 = bias_ref[0:1, :]                 # (1, 64)
    b2 = bias_ref[1:2, :]                 # (1, 64)
    b3 = bias_ref[2:3, 0:OUT_DIM]         # (1, 16)

    # Dense(32 -> 64) + ReLU   (bf16 operands, f32 accumulate, ReLU in f32)
    h = jnp.dot(x, w1_ref[...], preferred_element_type=jnp.float32) + b1
    h = jnp.maximum(h, 0.0).astype(w2_ref.dtype)

    # Dense(64 -> 64) [BatchNorm folded in] + ReLU
    h = jnp.dot(h, w2_ref[...], preferred_element_type=jnp.float32) + b2
    h = jnp.maximum(h, 0.0).astype(w3_ref.dtype)

    # Dense(64 -> 16) + Softmax(dim=1) — exact normalization (rows sum to 1).
    logits = jnp.dot(h, w3_ref[...], preferred_element_type=jnp.float32) + b3
    m = jnp.max(logits, axis=-1, keepdims=True)
    e = jnp.exp(logits - m)
    s = jnp.sum(e, axis=-1, keepdims=True)
    o_ref[...] = (e / s).astype(o_ref.dtype)


def _round_up(n, m):
    return ((n + m - 1) // m) * m


def _choose_batch_tile(batch, max_tile=16384):
    """Small batches: one resident full-array block.  Large batches: >= 2
    balanced tiles (keeps both v7x TensorCores busy), capped at max_tile rows
    so per-step overhead stays amortized while VMEM stays comfortable."""
    if batch <= 1024:
        return batch                       # full-array block (exempt from (8,128) rule)
    tile = _round_up(-(-batch // 2), 512)  # ceil(B/2) rounded to 512 -> >= 2 tiles
    return min(tile, max_tile)


def fold_params(params, *, mxu_dtype=jnp.bfloat16):
    """Fold eval-mode BatchNorm into dense2 and pack biases into one array."""
    (w1, b1, gamma, beta, rmean, rvar, w2, b2, w3, b3) = params
    scale = gamma * jax.lax.rsqrt(rvar + BN_EPS)          # (1, H1)
    shift = beta - rmean * scale                          # (1, H1)
    w2f = w2 * scale.reshape(H1, 1)                       # scale rows of w2
    b2f = shift @ w2 + b2                                 # (1, H2)

    bias_pack = jnp.zeros((3, H1), jnp.float32)
    bias_pack = bias_pack.at[0, :H1].set(b1[0])
    bias_pack = bias_pack.at[1, :H2].set(b2f[0])
    bias_pack = bias_pack.at[2, :OUT_DIM].set(b3[0])

    w1, w2f, w3 = (w.astype(mxu_dtype) for w in (w1, w2f, w3))
    return w1, w2f, w3, bias_pack


def nn_config_forward(x, params, *, mxu_dtype=jnp.bfloat16, max_tile=16384):
    """Run the whole MLP inside one Pallas kernel, tiled over the batch only."""
    w1, w2f, w3, bias_pack = fold_params(params, mxu_dtype=mxu_dtype)

    B = x.shape[0]
    x = x.astype(mxu_dtype)

    batch_tile = _choose_batch_tile(B, max_tile)
    num_tiles = pl.cdiv(B, batch_tile)     # ragged last block handled by Pallas,
                                           # no jnp.pad copy of x.

    # Parameters are passed as full, untiled blocks (block_shape == full array
    # shape, constant index_map -> DMA'd once, resident across grid steps).
    def full(arr):
        return pl.BlockSpec(arr.shape, lambda i: (0,) * arr.ndim)

    grid_spec = pltpu.PrefetchScalarGridSpec(
        num_scalar_prefetch=0,
        grid=(num_tiles,),
        in_specs=[
            pl.BlockSpec((batch_tile, IN_DIM), lambda i: (i, 0)),   # x tile
            full(w1), full(w2f), full(w3), full(bias_pack),
        ],
        out_specs=pl.BlockSpec((batch_tile, OUT_DIM), lambda i: (i, 0)),
    )

    out = pl.pallas_call(
        mlp_kernel,
        out_shape=jax.ShapeDtypeStruct((B, OUT_DIM), jnp.float32),
        grid_spec=grid_spec,
        compiler_params=pltpu.CompilerParams(
            dimension_semantics=("parallel",)),
    )(x, w1, w2f, w3, bias_pack)

    return out


def init_params(key):
    """Deterministic parameter init (shapes match the realized config)."""
    k1, k2, k3, k4, k5, k6 = jax.random.split(key, 6)

    def dense(kw, kb, fan_in, fan_out):
        bound = 1.0 / jnp.sqrt(fan_in)
        w = jax.random.uniform(kw, (fan_in, fan_out), jnp.float32, -bound, bound)
        b = jax.random.uniform(kb, (1, fan_out), jnp.float32, -bound, bound)
        return w, b

    w1, b1 = dense(k1, k2, IN_DIM, H1)
    w2, b2 = dense(k3, k4, H1, H2)
    w3, b3 = dense(k5, k6, H2, OUT_DIM)

    # BatchNorm1d(H1) parameters / running stats (PyTorch defaults).
    gamma = jnp.ones((1, H1), jnp.float32)
    beta = jnp.zeros((1, H1), jnp.float32)
    rmean = jnp.zeros((1, H1), jnp.float32)
    rvar = jnp.ones((1, H1), jnp.float32)

    return (w1, b1, gamma, beta, rmean, rvar, w2, b2, w3, b3)


def reference_forward(x, params):
    """Pure-JAX f32 reference with the *unfolded* BatchNorm (eval mode)."""
    (w1, b1, gamma, beta, rmean, rvar, w2, b2, w3, b3) = params
    h = jnp.maximum(x @ w1 + b1, 0.0)
    h = (h - rmean) * jax.lax.rsqrt(rvar + BN_EPS) * gamma + beta
    h = jnp.maximum(h @ w2 + b2, 0.0)
    logits = h @ w3 + b3
    return jax.nn.softmax(logits, axis=1)


if __name__ == "__main__":
    key = jax.random.PRNGKey(0)
    kx, kp = jax.random.split(key)

    B = 16
    x = jax.random.normal(kx, (B, IN_DIM), jnp.float32)
    params = init_params(kp)

    # Default (bf16 MXU operands, f32 accumulation / epilogue).
    out = jax.block_until_ready(nn_config_forward(x, params))
    # f32-operand path for a tight numerical check against the reference.
    out_f32 = jax.block_until_ready(
        nn_config_forward(x, params, mxu_dtype=jnp.float32))
    ref = reference_forward(x, params)

    assert out.shape == (B, OUT_DIM)
    # Exact softmax normalization -> rows sum to 1 to fp rounding.
    assert jnp.allclose(jnp.sum(out, axis=1), 1.0, atol=1e-3)
    assert jnp.allclose(jnp.sum(out_f32, axis=1), 1.0, atol=1e-3)
    # f32 path matches the unfolded reference tightly (BN fold is exact up to
    # rounding with any BN stats).
    assert jnp.allclose(out_f32, ref, atol=1e-4, rtol=1e-4)
    # bf16 MXU path: probabilities within ~1e-3 of the f32 reference.
    assert jnp.allclose(out, ref, atol=2e-2, rtol=2e-2)

    print("KERNEL_OK")
</pallas_src>

<mosaic_0001>
module attributes {stable_mosaic.version = 11 : i64} {
  func.func @mlp_kernel(%arg0: i32, %arg1: memref<16x32xbf16, #tpu.memory_space<vmem>>, %arg2: memref<32x64xbf16, #tpu.memory_space<vmem>>, %arg3: memref<64x64xbf16, #tpu.memory_space<vmem>>, %arg4: memref<64x16xbf16, #tpu.memory_space<vmem>>, %arg5: memref<3x64xf32, #tpu.memory_space<vmem>>, %arg6: memref<16x16xf32, #tpu.memory_space<vmem>>) attributes {dimension_semantics = [#tpu.dimension_semantics<parallel>], iteration_bounds = array<i64: 1>, scalar_prefetch = 0 : i64, scratch_operands = 0 : i64, tpu.core_type = #tpu.core_type<tc>, window_params = [{transform_indices = @transform_0, window_bounds = array<i64: 16, 32>}, {pipeline_mode = #tpu.pipeline_mode<synchronous>, transform_indices = @transform_1, window_bounds = array<i64: 32, 64>}, {pipeline_mode = #tpu.pipeline_mode<synchronous>, transform_indices = @transform_2, window_bounds = array<i64: 64, 64>}, {pipeline_mode = #tpu.pipeline_mode<synchronous>, transform_indices = @transform_3, window_bounds = array<i64: 64, 16>}, {pipeline_mode = #tpu.pipeline_mode<synchronous>, transform_indices = @transform_4, window_bounds = array<i64: 3, 64>}, {transform_indices = @transform_5, window_bounds = array<i64: 16, 16>}]} {
    %c0 = arith.constant 0 : index
    %c0_0 = arith.constant 0 : index
    %0 = vector.load %arg1[%c0, %c0_0] : memref<16x32xbf16, #tpu.memory_space<vmem>>, vector<16x32xbf16>
    %c0_1 = arith.constant 0 : index
    %c0_2 = arith.constant 0 : index
    %1 = vector.load %arg5[%c0_1, %c0_2] : memref<3x64xf32, #tpu.memory_space<vmem>>, vector<1x64xf32>
    %c1 = arith.constant 1 : index
    %c0_3 = arith.constant 0 : index
    %2 = vector.load %arg5[%c1, %c0_3] : memref<3x64xf32, #tpu.memory_space<vmem>>, vector<1x64xf32>
    %c2 = arith.constant 2 : index
    %c0_4 = arith.constant 0 : index
    %3 = vector.load %arg5[%c2, %c0_4] : memref<3x64xf32, #tpu.memory_space<vmem>>, vector<1x16xf32>
    %c0_5 = arith.constant 0 : index
    %c0_6 = arith.constant 0 : index
    %4 = vector.load %arg2[%c0_5, %c0_6] : memref<32x64xbf16, #tpu.memory_space<vmem>>, vector<32x64xbf16>
    %cst = arith.constant dense<0.000000e+00> : vector<16x64xf32>
    %5 = tpu.matmul %0, %4, %cst {dimension_numbers = #tpu.dot_dimension_numbers<[1], [0], [0], [1], [0, 0, 1, 1], [], []>} : vector<16x32xbf16>, vector<32x64xbf16>, vector<16x64xf32> -> vector<16x64xf32>
    %6 = vector.broadcast %1 : vector<1x64xf32> to vector<16x64xf32>
    %7 = arith.addf %5, %6 : vector<16x64xf32>
    %cst_7 = arith.constant 0.000000e+00 : f32
    %8 = vector.broadcast %cst_7 : f32 to vector<16x64xf32>
    %9 = arith.maximumf %7, %8 : vector<16x64xf32>
    %10 = arith.truncf %9 : vector<16x64xf32> to vector<16x64xbf16>
    %c0_8 = arith.constant 0 : index
    %c0_9 = arith.constant 0 : index
    %11 = vector.load %arg3[%c0_8, %c0_9] : memref<64x64xbf16, #tpu.memory_space<vmem>>, vector<64x64xbf16>
    %cst_10 = arith.constant dense<0.000000e+00> : vector<16x64xf32>
    %12 = tpu.matmul %10, %11, %cst_10 {dimension_numbers = #tpu.dot_dimension_numbers<[1], [0], [0], [1], [0, 0, 1, 1], [], []>} : vector<16x64xbf16>, vector<64x64xbf16>, vector<16x64xf32> -> vector<16x64xf32>
    %13 = vector.broadcast %2 : vector<1x64xf32> to vector<16x64xf32>
    %14 = arith.addf %12, %13 : vector<16x64xf32>
    %cst_11 = arith.constant 0.000000e+00 : f32
    %15 = vector.broadcast %cst_11 : f32 to vector<16x64xf32>
    %16 = arith.maximumf %14, %15 : vector<16x64xf32>
    %17 = arith.truncf %16 : vector<16x64xf32> to vector<16x64xbf16>
    %c0_12 = arith.constant 0 : index
    %c0_13 = arith.constant 0 : index
    %18 = vector.load %arg4[%c0_12, %c0_13] : memref<64x16xbf16, #tpu.memory_space<vmem>>, vector<64x16xbf16>
    %cst_14 = arith.constant dense<0.000000e+00> : vector<16x16xf32>
    %19 = tpu.matmul %17, %18, %cst_14 {dimension_numbers = #tpu.dot_dimension_numbers<[1], [0], [0], [1], [0, 0, 1, 1], [], []>} : vector<16x64xbf16>, vector<64x16xbf16>, vector<16x16xf32> -> vector<16x16xf32>
    %20 = vector.broadcast %3 : vector<1x16xf32> to vector<16x16xf32>
    %21 = arith.addf %19, %20 : vector<16x16xf32>
    %cst_15 = arith.constant dense<0xFF800000> : vector<16xf32>
    %22 = vector.multi_reduction <maximumf>, %21, %cst_15 [1] : vector<16x16xf32> to vector<16xf32>
    %23 = vector.shape_cast %22 : vector<16xf32> to vector<16x1xf32>
    %24 = vector.broadcast %23 : vector<16x1xf32> to vector<16x16xf32>
    %25 = arith.subf %21, %24 : vector<16x16xf32>
    %26 = math.exp %25 : vector<16x16xf32>
    %cst_16 = arith.constant dense<0.000000e+00> : vector<16xf32>
    %27 = vector.multi_reduction <add>, %26, %cst_16 [1] : vector<16x16xf32> to vector<16xf32>
    %28 = vector.shape_cast %27 : vector<16xf32> to vector<16x1xf32>
    %29 = vector.broadcast %28 : vector<16x1xf32> to vector<16x16xf32>
    %30 = arith.divf %26, %29 : vector<16x16xf32>
    %c0_17 = arith.constant 0 : index
    %c0_18 = arith.constant 0 : index
    %31 = vector.load %arg6[%c0_17, %c0_18] : memref<16x16xf32, #tpu.memory_space<vmem>>, vector<16x16xf32>
    tpu.vector_store %arg6[%c0_17, %c0_18], %30 {strides = array<i32>} : memref<16x16xf32, #tpu.memory_space<vmem>>, vector<16x16xf32>,
    return
  }
  func.func @transform_0(%arg0: i32) -> (i32, i32) {
    %c0_i32 = arith.constant 0 : i32
    %c0_i32_0 = arith.constant 0 : i32
    return %arg0, %c0_i32 : i32, i32
  }
  func.func @transform_1(%arg0: i32) -> (i32, i32) {
    %c0_i32 = arith.constant 0 : i32
    %c0_i32_0 = arith.constant 0 : i32
    %c0_i32_1 = arith.constant 0 : i32
    return %c0_i32, %c0_i32_0 : i32, i32
  }
  func.func @transform_2(%arg0: i32) -> (i32, i32) {
    %c0_i32 = arith.constant 0 : i32
    %c0_i32_0 = arith.constant 0 : i32
    %c0_i32_1 = arith.constant 0 : i32
    return %c0_i32, %c0_i32_0 : i32, i32
  }
  func.func @transform_3(%arg0: i32) -> (i32, i32) {
    %c0_i32 = arith.constant 0 : i32
    %c0_i32_0 = arith.constant 0 : i32
    %c0_i32_1 = arith.constant 0 : i32
    return %c0_i32, %c0_i32_0 : i32, i32
  }
  func.func @transform_4(%arg0: i32) -> (i32, i32) {
    %c0_i32 = arith.constant 0 : i32
    %c0_i32_0 = arith.constant 0 : i32
    %c0_i32_1 = arith.constant 0 : i32
    return %c0_i32, %c0_i32_0 : i32, i32
  }
  func.func @transform_5(%arg0: i32) -> (i32, i32) {
    %c0_i32 = arith.constant 0 : i32
    %c0_i32_0 = arith.constant 0 : i32
    return %arg0, %c0_i32 : i32, i32
  }
}

</mosaic_0001>

<bundles_post_ra>
// kernel: tpu_custom_call.1
= control target key start
LH: loop header
LB: loop body
LE: loop exit
PB: predicated region body
PF: predicated region fallthrough
CT: control target
= control target key end

     0   :  { %10 = vsyncpa [#allocation3], 0  ;;  %s510_s0 = inlined_call_operand.vmem [shape: bf16[16,32], index: 0, kind: input, shape index: {}]   ;;  %s511_s1 = inlined_call_operand.hbm [shape: bf16[32,64], index: 1, kind: input, shape index: {}]   ;;  %s512_s2 = inlined_call_operand.vmem [shape: bf16[64,64], index: 2, kind: input, shape index: {}]   ;;  %s513_s3 = inlined_call_operand.vmem [shape: bf16[64,16], index: 3, kind: input, shape index: {}]   ;;  %s514_s4 = inlined_call_operand.hbm [shape: f32[3,64], index: 4, kind: input, shape index: {}]   ;;  %s515_s5 = inlined_call_operand.hbm [shape: f32[16,16], index: 5, kind: output, shape index: {}]  }
   0x1   :  { %11 = vsyncpa [#allocation6], 0 }
   0x2   :  { %12 = vsyncpa [#allocation4], 0  ;;  %s19_s20 = sshll.u32 %s511_s1, 4  ;;  %s429_s21 = smov [#allocation2]   ;;  %s20_s20 = int_to_ptr.hbm [resolvable:$true] %s19_s20 }
   0x3   :  { %s21_s22 = sshll.u32 %s429_s21, 4  ;;  %s37_s25 = sshll.u32 %s514_s4, 4  ;;  %s22_s22 = int_to_ptr.vmem [resolvable:$true] %s21_s22  ;;  %s38_s25 = int_to_ptr.hbm [resolvable:$true] %s37_s25 }
   0x4   :  { %s430_s26 = smov 64   ;;  %s431_s27 = smov 4  }
   0x5   :  { %27 = dma.hbm_to_vmem [thread:$0]  %s20_s20, 256, %s22_s22, [#allocation3], %s430_s26, %s430_s26, %s431_s27  }
   0x6   :  { %s432_s28 = smov [#allocation5]  }
   0x7   :  { %s39_s29 = sshll.u32 %s432_s28, 4  ;;  %s40_s29 = int_to_ptr.vmem [resolvable:$true] %s39_s29 }
   0x8   :  { %42 = dma.hbm_to_vmem [thread:$0]  %s38_s25, 64, %s40_s29, [#allocation6]  }
   0x9   :  { %423 = dma.done.wait [#allocation3], 256  }
   0xa   :  { %424 = vsyncadd [#allocation3], 4294967040 }
   0xb   :  { %425 = dma.done.wait [#allocation6], 64  }
   0xc   :  { %426 = vsyncadd [#allocation6], 4294967232  ;;  %v324_v0 = vld [vmem:[#allocation2 + $0x8] sm:$0xff]  ;;  %v323_v1 = vld [vmem:[#allocation2] sm:$0xff]  ;;  %vm79_vm0 = vcmask 261120   ;;  %vm133_vm1 = vcmask 523264  }
   0xd   :  { %89 = vmatpush.bf16.msra.mxu0 %v324_v0  ;;  %v322_v2 = vld [vmem:[%s510_s0] sm:$0xff]  ;;  %v328_v3 = vld [vmem:[%s512_s2 + $0x18] sm:$0xff]  ;;  %v327_v4 = vld [vmem:[%s512_s2 + $0x10] sm:$0xff]  ;;  %vm204_vm2 = vcmask 130048   ;;  %s261_s22 = sshll.u32 %s515_s5, 4  ;;  %s434_s23 = smov 128   ;;  %s262_s22 = int_to_ptr.hbm [resolvable:$true] %s261_s22 }
   0xe   :  { %141 = vmatpush.bf16.msra.mxu1 %v328_v3  ;;  %v326_v5 = vld [vmem:[%s512_s2 + $0x8] sm:$0xff]  ;;  %v325_v6 = vld [vmem:[%s512_s2] sm:$0xff]  ;;  %v340_v8 = vld [vmem:[#allocation5] ss:$0 sm:$0xff]  ;;  %s435_s24 = smov 8  }
   0xf   :  { %v332_v15 = vld [vmem:[%s513_s3 + $0x18] sm:$0xff]  ;;  %v331_v16 = vld [vmem:[%s513_s3 + $0x10] sm:$0xff]  ;;  %v330_v17 = vld [vmem:[%s513_s3 + $0x8] sm:$0xff] }
  0x10   :  { %194 = vmatpush.bf16.msra.mxu2 %v332_v15  ;;  %v329_v18 = vld [vmem:[%s513_s3] sm:$0xff]  ;;  %v341_v20 = vld [vmem:[#allocation5 + $0x1] ss:$0 sm:$0xff]  ;;  %v342_v27 = vld [vmem:[#allocation5 + $0x2] ss:$0 sm:$0xff]  ;;  %s433_s3 = smov [#allocation7]  }
  0x11   :  { %90 = vmatpush.bf16.msra.mxu0 %v323_v1  ;;  %s259_s19 = sshll.u32 %s433_s3, 4  ;;  %s260_s19 = int_to_ptr.vmem [resolvable:$true] %s259_s19 }
  0x12   :  { %142 = vmatpush.bf16.msra.mxu1 %v327_v4 }
  0x14   :  { %287 = vmatmul.msk.bf16.vlgmr.msra.gmra.mxu0 %vm79_vm0, %v322_v2  ;;  %195 = vmatpush.bf16.msra.mxu2 %v331_v16 }
  0x16   :  { %143 = vmatpush.bf16.msra.mxu1 %v326_v5 }
  0x18   :  { %196 = vmatpush.bf16.msra.mxu2 %v330_v17 }
  0x1a   :  { %144 = vmatpush.bf16.msra.mxu1 %v325_v6 }
  0x1c   :  { %197 = vmatpush.bf16.msra.mxu2 %v329_v18 }
  0x91   :  { %v92_v7 = vpop.f32.mrf.mxu0 }
  0x92   :  { %v93_v9 = vadd.f32 %v340_v8, %v92_v7 }
  0x94   :  { %v97_v12 = vmax.f32 %v93_v9, 0.0 }
  0x99   :  { %v94_v10 = vpop.f32.mrf.mxu0 }
  0x9a   :  { %v95_v11 = vadd.f32 %v340_v8, %v94_v10 }
  0x9c   :  { %v98_v13 = vmax.f32 %v95_v11, 0.0 }
  0x9e   :  { %v99_v14 = vpack.c.bf16 %v98_v13, %v97_v12 }
  0xa0   :  { %304 = vmatmul.msk.bf16.vlgmr.msra.gmra.mxu1 %vm133_vm1, %v99_v14 }
 0x11d   :  { %v146_v19 = vpop.f32.mrf.mxu1 }
 0x11e   :  { %v147_v21 = vadd.f32 %v341_v20, %v146_v19 }
 0x120   :  { %v151_v24 = vmax.f32 %v147_v21, 0.0 }
 0x125   :  { %v148_v22 = vpop.f32.mrf.mxu1 }
 0x126   :  { %v149_v23 = vadd.f32 %v341_v20, %v148_v22 }
 0x128   :  { %v152_v25 = vmax.f32 %v149_v23, 0.0 }
 0x12a   :  { %v153_v26 = vpack.c.bf16 %v152_v25, %v151_v24 }
 0x12c   :  { %321 = vmatmul.msk.bf16.vlgmr.msra.gmra.mxu2 %vm133_vm1, %v153_v26 }
 0x1af   :  { %v199_v28 = vpop.f32.mrf.mxu2 }
 0x1b0   :  { %v200_v29 = vadd.f32 %v342_v27, %v199_v28 }
 0x1b2   :  { %v205_v30 = vsel %vm204_vm2, %v200_v29, -inf }
 0x1b3   :  { %206 = vmax.xlane.f32.xlu0 %v205_v30 }
 0x1b7   :  { %v201_v31 = vpop.f32.mrf.mxu2 }
 0x1b8   :  { %v202_v32 = vadd.f32 %v342_v27, %v201_v31 }
 0x1ba   :  { %v208_v33 = vsel %vm204_vm2, %v202_v32, -inf }
 0x1bb   :  { %209 = vmax.xlane.f32.xlu0 %v208_v33 }
 0x226   :  { %v207_v34 = vpop.xlane.xlu0 %206 }
 0x227   :  { %v211_v35 = vsub.f32 %v200_v29, %v207_v34 }
 0x229   :  { %v213_v36 = vmul.f32 1.442695, %v211_v35 }
 0x22b   :  { %343 = vpow2.f32 %v213_v36 }
 0x22e   :  { %v210_v37 = vpop.xlane.xlu0 %209 }
 0x22f   :  { %v212_v38 = vsub.f32 %v202_v32, %v210_v37 }
 0x231   :  { %v344_v39 = vpop.eup %343  ;;  %v215_v40 = vmul.f32 1.442695, %v212_v38 }
 0x232   :  { %v217_v41 = vsel %vm204_vm2, %v344_v39, 0.0 }
 0x233   :  { %345 = vpow2.f32 %v215_v40  ;;  %218 = vadd.xlane.f32.xlu1 %v217_v41 }
 0x239   :  { %v346_v42 = vpop.eup %345 }
 0x23a   :  { %v220_v43 = vsel %vm204_vm2, %v346_v42, 0.0 }
 0x23b   :  { %221 = vadd.xlane.f32.xlu1 %v220_v43 }
 0x2a6   :  { %v219_v44 = vpop.xlane.xlu1 %218 }
 0x2a7   :  { %347 = vrcp.f32 %v219_v44  ;;  %v234_v49 = vand.u32 2147483648, %v219_v44  ;;  %v232_v51 = vand.u32 2147483647, %v219_v44  ;;  %vm228_vm4 = vweird.f32 %v219_v44 }
 0x2a9   :  { %v235_v54 = vor.u32 1.1754944e-38, %v234_v49  ;;  %vm233_vm6 = vcmp.eq.f32.partialorder %v232_v51, 8.507059e+37 }
 0x2ad   :  { %v348_v45 = vpop.eup %347 }
 0x2ae   :  { %v224_v46 = vmul.f32 %v348_v45, %v219_v44  ;;  %v222_v47 = vpop.xlane.xlu1 %221  ;;  %vm229_vm3 = vweird.f32 %v348_v45 }
 0x2af   :  { %349 = vrcp.f32 %v222_v47  ;;  %vm230_vm5 = vmor %vm228_vm4, %vm229_vm3  ;;  %v249_v60 = vand.u32 2147483648, %v222_v47  ;;  %v247_v62 = vand.u32 2147483647, %v222_v47  ;;  %vm243_vm8 = vweird.f32 %v222_v47 }
 0x2b0   :  { %v225_v48 = vsub.f32 1.0, %v224_v46 }
 0x2b1   :  { %v250_v0 = vor.u32 1.1754944e-38, %v249_v60  ;;  %vm248_vm10 = vcmp.eq.f32.partialorder %v247_v62, 8.507059e+37 }
 0x2b2   :  { %v226_v50 = vmul.f32 %v348_v45, %v225_v48 }
 0x2b4   :  { %v227_v52 = vadd.f32 %v348_v45, %v226_v50 }
 0x2b5   :  { %v350_v53 = vpop.eup %349 }
 0x2b6   :  { %v231_v55 = vsel %vm230_vm5, %v348_v45, %v227_v52  ;;  %v239_v56 = vmul.f32 %v350_v53, %v222_v47  ;;  %vm244_vm7 = vweird.f32 %v350_v53 }
 0x2b7   :  { %v236_v57 = vsel %vm233_vm6, %v235_v54, %v231_v55  ;;  %vm245_vm9 = vmor %vm243_vm8, %vm244_vm7 }
 0x2b8   :  { %v237_v58 = vmul.f32 %v344_v39, %v236_v57  ;;  %v240_v59 = vsub.f32 1.0, %v239_v56 }
 0x2ba   :  { %253 = vst.msk [vmem:[#allocation7] sm:$0xff] %vm204_vm2, %v237_v58  ;;  %v241_v61 = vmul.f32 %v350_v53, %v240_v59 }
 0x2bc   :  { %v242_v63 = vadd.f32 %v350_v53, %v241_v61 }
 0x2be   :  { %v246_v1 = vsel %vm245_vm9, %v350_v53, %v242_v63 }
 0x2bf   :  { %v251_v2 = vsel %vm248_vm10, %v250_v0, %v246_v1 }
 0x2c0   :  { %v252_v3 = vmul.f32 %v346_v42, %v251_v2 }
 0x2c2   :  { %254 = vst.msk [vmem:[#allocation7 + $0x8] sm:$0xff] %vm204_vm2, %v252_v3 }
 0x2c3   :  { %267 = dma.vmem_to_hbm [thread:$0]  %s260_s19, 256, %s262_s22, [#allocation4], %s434_s23, %s434_s23, %s435_s24  }
 0x2c4   :  { %427 = dma.done.wait [#allocation4], 256  }
 0x2c5   :  { %428 = vsyncadd [#allocation4], 4294967040 }
 0x2c6   :  { %272 = vsyncpa [#allocation3], 1 }
 0x2c7   :  { %273 = vsyncpa [#allocation6], 1 }
 0x2c8   :  { %274 = vsyncpa [#allocation4], 1 }

</bundles_post_ra>
